<compile_context>
chip_gen: v5e
topology: v5e:2x2
jax: 0.10.0
libtpu: 0.0.40
codegen_flags: <defaults>
</compile_context>

<pallas_src>
import functools

import jax
import jax.numpy as jnp
from jax import lax
from jax.experimental import pallas as pl
from jax.experimental.pallas import tpu as pltpu


def _mha_kernel(x_ref, wqkv_ref, bqkv_ref, wp_ref, bp_ref, o_ref,
                q_sc, k_sc, v_sc, *rest,
                n_heads, head_dim, block_q, s_chunk):
    """One grid step = (one batch block b, one query-row tile qi).

    qi == 0 : fused QKV projection for the whole batch block (chunked over S to
              bound the live f32 intermediate); q (scale folded into weights),
              k (pre-transposed to (g, hd, S)) and v stashed in VMEM scratch.
    every qi: attention of `block_q` query rows vs. all S keys (all heads in one
              batched NN dot_general) + output projection for those rows.
    """
    Bt, S, D = x_ref.shape
    H, hd = n_heads, head_dim
    qi = pl.program_id(1)
    kt_sc = rest[0] if rest else None      # K staging scratch (chunked path only)

    def split_heads(m2d, rows):            # (Bt*rows, D) f32 -> (Bt*H, rows, hd)
        m = m2d.reshape(Bt, rows, H, hd)
        return jnp.swapaxes(m, 1, 2).reshape(Bt * H, rows, hd)

    # ---- per-batch-block prologue: fused QKV projection (bf16 MXU, f32 acc) ---
    @pl.when(qi == 0)
    def _():
        if s_chunk == S:                                   # static branch
            # Single fused pass; static stores only.
            x2d = x_ref[...].reshape(Bt * S, D)
            qkv = jnp.dot(x2d, wqkv_ref[...],
                          preferred_element_type=jnp.float32) + bqkv_ref[...]
            q_sc[...] = split_heads(qkv[:, :D], S).astype(q_sc.dtype)
            # K stored pre-transposed once per batch block -> NN score matmul.
            k_sc[...] = jnp.swapaxes(split_heads(qkv[:, D:2 * D], S),
                                     1, 2).astype(k_sc.dtype)
            v_sc[...] = split_heads(qkv[:, 2 * D:], S).astype(v_sc.dtype)
        else:
            # Chunk over S so the live f32 qkv temp stays bounded.
            n_chunks = S // s_chunk

            def body(c, carry):
                start = pl.multiple_of(c * s_chunk, s_chunk)
                xc = x_ref[:, pl.ds(start, s_chunk), :].reshape(Bt * s_chunk, D)
                qkv = jnp.dot(xc, wqkv_ref[...],
                              preferred_element_type=jnp.float32) + bqkv_ref[...]
                q_sc[:, pl.ds(start, s_chunk), :] = (
                    split_heads(qkv[:, :D], s_chunk).astype(q_sc.dtype))
                kt_sc[:, pl.ds(start, s_chunk), :] = (
                    split_heads(qkv[:, D:2 * D], s_chunk).astype(kt_sc.dtype))
                v_sc[:, pl.ds(start, s_chunk), :] = (
                    split_heads(qkv[:, 2 * D:], s_chunk).astype(v_sc.dtype))
                return carry

            lax.fori_loop(0, n_chunks, body, 0, unroll=n_chunks <= 8)
            # Pay the K transpose ONCE per batch block (not once per q tile).
            k_sc[...] = jnp.swapaxes(kt_sc[...], 1, 2)

    # ---- attention for this q tile (all heads batched in one dot_general) -----
    if block_q == S:                                       # static branch
        qt = q_sc[...]                                     # (Bt*H, S, hd)
    else:
        qstart = pl.multiple_of(qi * block_q, block_q)
        qt = q_sc[:, pl.ds(qstart, block_q), :]            # (Bt*H, tq, hd)

    # NN contraction: K already (g, hd, S); scale already folded into weights.
    s = jnp.einsum("gqd,gdk->gqk", qt, k_sc[...],
                   preferred_element_type=jnp.float32)     # (g, tq, S) f32
    m = jnp.max(s, axis=-1, keepdims=True)
    e = jnp.exp(s - m)
    denom = jnp.sum(e, axis=-1, keepdims=True)
    # TODO(synk): dropout on attention weights (training) not implemented.
    ctx = jnp.einsum("gqk,gkd->gqd", e.astype(v_sc.dtype), v_sc[...],
                     preferred_element_type=jnp.float32)   # (g, tq, hd) f32
    ctx = ctx * pl.reciprocal(denom, approx=True)          # EUP divide

    # ---- merge heads + output projection ---------------------------------------
    ctx = jnp.swapaxes(ctx.reshape(Bt, H, block_q, hd), 1, 2)   # (Bt, tq, H, hd)
    ctx = ctx.reshape(Bt * block_q, D).astype(wp_ref.dtype)
    y = jnp.dot(ctx, wp_ref[...],
                preferred_element_type=jnp.float32) + bp_ref[...]
    o_ref[...] = y.reshape(Bt, block_q, D).astype(o_ref.dtype)


def _vmem_limit_bytes():
    """Generation-aware VMEM request: ~56 MiB on 64 MiB parts (v7x),
    ~112 MiB on 128 MiB parts (v5e/v6e).  Falls back to the conservative
    64 MiB capacity if the hardware query is unavailable."""
    cap = 64 * 1024 * 1024
    try:
        cap = int(pltpu.get_tpu_info().vmem_capacity_bytes)
    except Exception:
        pass
    return max(32 * 1024 * 1024, min(cap * 7 // 8, cap - (8 << 20)))


def multi_head_attention(x, params, n_heads, *, compute_dtype=jnp.bfloat16,
                         block_b=None, block_q=None, prologue_chunk=None):
    """x: (B, S, D).  params: pre-transposed (in,out) weights + (out,) biases."""
    B, S, D = x.shape
    assert D % n_heads == 0
    head_dim = D // n_heads
    scale = head_dim ** -0.5

    # ---- fused (D, 3D) QKV projection; 1/sqrt(hd) folded into the Q columns ----
    # (one-time O(D^2) host-side scaling of weights, not per-step activation work)
    w_qkv = jnp.concatenate([params["wq"] * scale, params["wk"], params["wv"]],
                            axis=1).astype(compute_dtype)
    b_qkv = jnp.concatenate([params["bq"] * scale, params["bk"], params["bv"]]
                            ).reshape(1, 3 * D).astype(jnp.float32)
    w_p = params["wp"].astype(compute_dtype)
    b_p = params["bp"].reshape(1, D).astype(jnp.float32)
    x_c = x.astype(compute_dtype)

    vmem_limit = int(_vmem_limit_bytes())
    dtb = 2                                          # bf16 bytes
    w_bytes = 4 * D * D * dtb + 4 * D * 4            # resident weights + f32 biases

    # ---- block_b: batch rows per step (keep grid[0] >= 2 so both TCs are fed) --
    if block_b is None:
        block_b = 1
        for bb in (16, 8, 4, 2):
            if B % bb or B // bb < 2:
                continue
            stash = 4 * bb * S * D * dtb             # q/k/v (+K staging) scratch
            xbuf = 2 * bb * S * D * dtb              # double-buffered input block
            if w_bytes + stash + xbuf <= vmem_limit // 2:
                block_b = bb
                break
    assert B % block_b == 0

    # ---- block_q: query rows per step, capped by live f32 score-tensor size ----
    if block_q is None:
        score_cap = min(vmem_limit // 16, 8 << 20)
        block_q = S
        if S % 8 == 0:
            for tq in (512, 256, 128, 64, 32, 16, 8):
                if S % tq:
                    continue
                if 2 * block_b * n_heads * tq * S * 4 <= score_cap or tq == 8:
                    block_q = tq
                    break
    assert S % block_q == 0

    # ---- prologue chunk: bound the live f32 qkv intermediate -------------------
    if prologue_chunk is None:
        prologue_cap = min(vmem_limit // 8, 4 << 20)
        s_chunk = S
        while (block_b * s_chunk * 3 * D * 4 > prologue_cap
               and s_chunk % 16 == 0 and s_chunk // 2 >= 128):
            s_chunk //= 2
    else:
        s_chunk = prologue_chunk
    assert S % s_chunk == 0
    chunked = s_chunk != S

    grid = (B // block_b, S // block_q)
    kernel = functools.partial(_mha_kernel, n_heads=n_heads, head_dim=head_dim,
                               block_q=block_q, s_chunk=s_chunk)

    # Weights/biases never change across the grid: single VMEM-resident copies
    # (no blocked pipelining, no double buffering).
    resident = pl.BlockSpec(memory_space=pltpu.MemorySpace.VMEM)

    g = block_b * n_heads
    scratch = [pltpu.VMEM((g, S, head_dim), compute_dtype),    # q (pre-scaled)
               pltpu.VMEM((g, head_dim, S), compute_dtype),    # k^T
               pltpu.VMEM((g, S, head_dim), compute_dtype)]    # v
    if chunked:
        scratch.append(pltpu.VMEM((g, S, head_dim), compute_dtype))  # K staging

    return pl.pallas_call(
        kernel,
        out_shape=jax.ShapeDtypeStruct((B, S, D), x.dtype),
        grid_spec=pltpu.PrefetchScalarGridSpec(
            num_scalar_prefetch=0,
            grid=grid,
            in_specs=[
                pl.BlockSpec((block_b, S, D), lambda b, q: (b, 0, 0)),  # x
                resident, resident,                                     # w_qkv, b_qkv
                resident, resident,                                     # w_p,   b_p
            ],
            out_specs=pl.BlockSpec((block_b, block_q, D),
                                   lambda b, q: (b, q, 0)),
            scratch_shapes=scratch,
        ),
        compiler_params=pltpu.CompilerParams(
            dimension_semantics=("parallel", "arbitrary"),
            vmem_limit_bytes=vmem_limit,
        ),
    )(x_c, w_qkv, b_qkv, w_p, b_p)


def _reference(x, params, n_heads):
    """Pure-JAX f32 reference mirroring the PyTorch forward (eval mode)."""
    B, S, D = x.shape
    hd = D // n_heads
    scale = hd ** -0.5

    def lin(z, w, b):
        return z @ w + b

    q = lin(x, params["wq"], params["bq"]).reshape(B, S, n_heads, hd).transpose(0, 2, 1, 3)
    k = lin(x, params["wk"], params["bk"]).reshape(B, S, n_heads, hd).transpose(0, 2, 1, 3)
    v = lin(x, params["wv"], params["bv"]).reshape(B, S, n_heads, hd).transpose(0, 2, 1, 3)
    scores = jnp.einsum("bhqd,bhkd->bhqk", q, k) * scale
    attn = jax.nn.softmax(scores, axis=-1)
    out = jnp.einsum("bhqk,bhkd->bhqd", attn, v)
    out = out.transpose(0, 2, 1, 3).reshape(B, S, D)
    return lin(out, params["wp"], params["bp"])


def init_params(key, dim):
    """Deterministic synthetic init (PyTorch-Linear-like uniform bounds).
    Weights stored pre-transposed: (in_features, out_features)."""
    bound = dim ** -0.5
    keys = jax.random.split(key, 8)
    u = lambda k, shape: jax.random.uniform(k, shape, jnp.float32, -bound, bound)
    return {
        "wq": u(keys[0], (dim, dim)), "bq": u(keys[1], (dim,)),
        "wk": u(keys[2], (dim, dim)), "bk": u(keys[3], (dim,)),
        "wv": u(keys[4], (dim, dim)), "bv": u(keys[5], (dim,)),
        "wp": u(keys[6], (dim, dim)), "bp": u(keys[7], (dim,)),
    }


if __name__ == "__main__":
    # ---- test 1: module-sized demo shape (single-pass prologue, one q tile) ----
    B, S, DIM, N_HEADS = 2, 8, 32, 4
    kx, kp = jax.random.split(jax.random.PRNGKey(0))
    x = jax.random.normal(kx, (B, S, DIM), jnp.float32)
    params = init_params(kp, DIM)

    out = jax.block_until_ready(multi_head_attention(x, params, N_HEADS))
    ref = _reference(x, params, N_HEADS)
    assert out.shape == (B, S, DIM)
    # bf16 MXU operands (f32 accumulation) vs. pure-f32 reference -> relaxed tol.
    assert jnp.allclose(out, ref, atol=3e-2, rtol=3e-2), \
        f"max abs err {jnp.max(jnp.abs(out - ref))}"

    # ---- test 2: exercise the chunked prologue + multi-q-tile attention path ---
    B2, S2, DIM2, H2 = 2, 256, 128, 4
    kx2, kp2 = jax.random.split(jax.random.PRNGKey(1))
    x2 = jax.random.normal(kx2, (B2, S2, DIM2), jnp.float32)
    params2 = init_params(kp2, DIM2)

    out2 = jax.block_until_ready(
        multi_head_attention(x2, params2, H2, block_q=64, prologue_chunk=128))
    ref2 = _reference(x2, params2, H2)
    assert out2.shape == (B2, S2, DIM2)
    assert jnp.allclose(out2, ref2, atol=5e-2, rtol=5e-2), \
        f"max abs err {jnp.max(jnp.abs(out2 - ref2))}"

    print("KERNEL_OK")
</pallas_src>

<mosaic_0001>
module attributes {stable_mosaic.version = 11 : i64} {
  func.func @_mha_kernel(%arg0: i32, %arg1: i32, %arg2: memref<1x8x32xbf16, #tpu.memory_space<vmem>>, %arg3: memref<32x96xbf16, #tpu.memory_space<vmem>>, %arg4: memref<1x96xf32, #tpu.memory_space<vmem>>, %arg5: memref<32x32xbf16, #tpu.memory_space<vmem>>, %arg6: memref<1x32xf32, #tpu.memory_space<vmem>>, %arg7: memref<1x8x32xf32, #tpu.memory_space<vmem>>, %arg8: memref<4x8x8xbf16, #tpu.memory_space<vmem>>, %arg9: memref<4x8x8xbf16, #tpu.memory_space<vmem>>, %arg10: memref<4x8x8xbf16, #tpu.memory_space<vmem>>) attributes {dimension_semantics = [#tpu.dimension_semantics<parallel>, #tpu.dimension_semantics<arbitrary>], iteration_bounds = array<i64: 2, 1>, scalar_prefetch = 0 : i64, scratch_operands = 3 : i64, tpu.core_type = #tpu.core_type<tc>, window_params = [{transform_indices = @transform_0, window_bounds = array<i64: 1, 8, 32>}, {pipeline_mode = #tpu.pipeline_mode<synchronous>, transform_indices = @transform_1, window_bounds = array<i64: 32, 96>}, {pipeline_mode = #tpu.pipeline_mode<synchronous>, transform_indices = @transform_2, window_bounds = array<i64: 1, 96>}, {pipeline_mode = #tpu.pipeline_mode<synchronous>, transform_indices = @transform_3, window_bounds = array<i64: 32, 32>}, {pipeline_mode = #tpu.pipeline_mode<synchronous>, transform_indices = @transform_4, window_bounds = array<i64: 1, 32>}, {transform_indices = @transform_5, window_bounds = array<i64: 1, 8, 32>}]} {
    %c0_i32 = arith.constant 0 : i32
    %0 = arith.cmpi eq, %arg1, %c0_i32 : i32
    %1 = arith.extui %0 : i1 to i32
    %c0_i32_0 = arith.constant 0 : i32
    %2 = arith.cmpi ne, %1, %c0_i32_0 : i32
    scf.if %2 {
      %c0_20 = arith.constant 0 : index
      %c0_21 = arith.constant 0 : index
      %c0_22 = arith.constant 0 : index
      %30 = vector.load %arg2[%c0_20, %c0_21, %c0_22] : memref<1x8x32xbf16, #tpu.memory_space<vmem>>, vector<1x8x32xbf16>
      %31 = vector.shape_cast %30 : vector<1x8x32xbf16> to vector<8x32xbf16>
      %c0_23 = arith.constant 0 : index
      %c0_24 = arith.constant 0 : index
      %32 = vector.load %arg3[%c0_23, %c0_24] : memref<32x96xbf16, #tpu.memory_space<vmem>>, vector<32x96xbf16>
      %cst_25 = arith.constant dense<0.000000e+00> : vector<8x96xf32>
      %33 = tpu.matmul %31, %32, %cst_25 {dimension_numbers = #tpu.dot_dimension_numbers<[1], [0], [0], [1], [0, 0, 1, 1], [], []>} : vector<8x32xbf16>, vector<32x96xbf16>, vector<8x96xf32> -> vector<8x96xf32>
      %c0_26 = arith.constant 0 : index
      %c0_27 = arith.constant 0 : index
      %34 = vector.load %arg4[%c0_26, %c0_27] : memref<1x96xf32, #tpu.memory_space<vmem>>, vector<1x96xf32>
      %35 = vector.broadcast %34 : vector<1x96xf32> to vector<8x96xf32>
      %36 = arith.addf %33, %35 : vector<8x96xf32>
      %37 = vector.extract_strided_slice %36 {offsets = [0, 0], sizes = [8, 32], strides = [1, 1]} : vector<8x96xf32> to vector<8x32xf32>
      %38 = vector.shape_cast %37 : vector<8x32xf32> to vector<1x8x4x8xf32>
      %39 = tpu.transpose %38, [0, 2, 1, 3] : vector<1x8x4x8xf32> -> vector<1x4x8x8xf32>
      %40 = vector.shape_cast %39 : vector<1x4x8x8xf32> to vector<4x8x8xf32>
      %41 = arith.truncf %40 : vector<4x8x8xf32> to vector<4x8x8xbf16>
      %c0_28 = arith.constant 0 : index
      %c0_29 = arith.constant 0 : index
      %c0_30 = arith.constant 0 : index
      %42 = vector.load %arg8[%c0_28, %c0_29, %c0_30] : memref<4x8x8xbf16, #tpu.memory_space<vmem>>, vector<4x8x8xbf16>
      tpu.vector_store %arg8[%c0_28, %c0_29, %c0_30], %41 {strides = array<i32>} : memref<4x8x8xbf16, #tpu.memory_space<vmem>>, vector<4x8x8xbf16>,
      %43 = vector.extract_strided_slice %36 {offsets = [0, 32], sizes = [8, 32], strides = [1, 1]} : vector<8x96xf32> to vector<8x32xf32>
      %44 = vector.shape_cast %43 : vector<8x32xf32> to vector<1x8x4x8xf32>
      %45 = tpu.transpose %44, [0, 2, 1, 3] : vector<1x8x4x8xf32> -> vector<1x4x8x8xf32>
      %46 = vector.shape_cast %45 : vector<1x4x8x8xf32> to vector<4x8x8xf32>
      %47 = tpu.transpose %46, [0, 2, 1] : vector<4x8x8xf32> -> vector<4x8x8xf32>
      %48 = arith.truncf %47 : vector<4x8x8xf32> to vector<4x8x8xbf16>
      %c0_31 = arith.constant 0 : index
      %c0_32 = arith.constant 0 : index
      %c0_33 = arith.constant 0 : index
      %49 = vector.load %arg9[%c0_31, %c0_32, %c0_33] : memref<4x8x8xbf16, #tpu.memory_space<vmem>>, vector<4x8x8xbf16>
      tpu.vector_store %arg9[%c0_31, %c0_32, %c0_33], %48 {strides = array<i32>} : memref<4x8x8xbf16, #tpu.memory_space<vmem>>, vector<4x8x8xbf16>,
      %50 = vector.extract_strided_slice %36 {offsets = [0, 64], sizes = [8, 32], strides = [1, 1]} : vector<8x96xf32> to vector<8x32xf32>
      %51 = vector.shape_cast %50 : vector<8x32xf32> to vector<1x8x4x8xf32>
      %52 = tpu.transpose %51, [0, 2, 1, 3] : vector<1x8x4x8xf32> -> vector<1x4x8x8xf32>
      %53 = vector.shape_cast %52 : vector<1x4x8x8xf32> to vector<4x8x8xf32>
      %54 = arith.truncf %53 : vector<4x8x8xf32> to vector<4x8x8xbf16>
      %c0_34 = arith.constant 0 : index
      %c0_35 = arith.constant 0 : index
      %c0_36 = arith.constant 0 : index
      %55 = vector.load %arg10[%c0_34, %c0_35, %c0_36] : memref<4x8x8xbf16, #tpu.memory_space<vmem>>, vector<4x8x8xbf16>
      tpu.vector_store %arg10[%c0_34, %c0_35, %c0_36], %54 {strides = array<i32>} : memref<4x8x8xbf16, #tpu.memory_space<vmem>>, vector<4x8x8xbf16>,
    } else {
    }
    %c0 = arith.constant 0 : index
    %c0_1 = arith.constant 0 : index
    %c0_2 = arith.constant 0 : index
    %3 = vector.load %arg8[%c0, %c0_1, %c0_2] : memref<4x8x8xbf16, #tpu.memory_space<vmem>>, vector<4x8x8xbf16>
    %c0_3 = arith.constant 0 : index
    %c0_4 = arith.constant 0 : index
    %c0_5 = arith.constant 0 : index
    %4 = vector.load %arg9[%c0_3, %c0_4, %c0_5] : memref<4x8x8xbf16, #tpu.memory_space<vmem>>, vector<4x8x8xbf16>
    "tpu.trace_start"() <{level = 10 : i32, message = "gqd,gdk->gqk"}> : () -> ()
    %cst = arith.constant dense<0.000000e+00> : vector<4x8x8xf32>
    %5 = tpu.matmul %3, %4, %cst {dimension_numbers = #tpu.dot_dimension_numbers<[2], [1], [1], [2], [0, 0, 0, 1, 1, 2], [0], [0]>} : vector<4x8x8xbf16>, vector<4x8x8xbf16>, vector<4x8x8xf32> -> vector<4x8x8xf32>
    "tpu.trace_stop"() : () -> ()
    %cst_6 = arith.constant dense<0xFF800000> : vector<4x8xf32>
    %6 = vector.multi_reduction <maximumf>, %5, %cst_6 [2] : vector<4x8x8xf32> to vector<4x8xf32>
    %7 = vector.shape_cast %6 : vector<4x8xf32> to vector<4x8x1xf32>
    %8 = vector.broadcast %7 : vector<4x8x1xf32> to vector<4x8x8xf32>
    %9 = arith.subf %5, %8 : vector<4x8x8xf32>
    %10 = math.exp %9 : vector<4x8x8xf32>
    %cst_7 = arith.constant dense<0.000000e+00> : vector<4x8xf32>
    %11 = vector.multi_reduction <add>, %10, %cst_7 [2] : vector<4x8x8xf32> to vector<4x8xf32>
    %12 = vector.shape_cast %11 : vector<4x8xf32> to vector<4x8x1xf32>
    %13 = arith.truncf %10 : vector<4x8x8xf32> to vector<4x8x8xbf16>
    %c0_8 = arith.constant 0 : index
    %c0_9 = arith.constant 0 : index
    %c0_10 = arith.constant 0 : index
    %14 = vector.load %arg10[%c0_8, %c0_9, %c0_10] : memref<4x8x8xbf16, #tpu.memory_space<vmem>>, vector<4x8x8xbf16>
    "tpu.trace_start"() <{level = 10 : i32, message = "gqk,gkd->gqd"}> : () -> ()
    %cst_11 = arith.constant dense<0.000000e+00> : vector<4x8x8xf32>
    %15 = tpu.matmul %13, %14, %cst_11 {dimension_numbers = #tpu.dot_dimension_numbers<[2], [1], [1], [2], [0, 0, 0, 1, 1, 2], [0], [0]>} : vector<4x8x8xbf16>, vector<4x8x8xbf16>, vector<4x8x8xf32> -> vector<4x8x8xf32>
    "tpu.trace_stop"() : () -> ()
    %16 = tpu.reciprocal %12 {approx = true} : vector<4x8x1xf32> -> vector<4x8x1xf32>
    %17 = vector.broadcast %16 : vector<4x8x1xf32> to vector<4x8x8xf32>
    %18 = arith.mulf %15, %17 : vector<4x8x8xf32>
    %19 = vector.shape_cast %18 : vector<4x8x8xf32> to vector<1x4x8x8xf32>
    %20 = tpu.transpose %19, [0, 2, 1, 3] : vector<1x4x8x8xf32> -> vector<1x8x4x8xf32>
    %21 = vector.shape_cast %20 : vector<1x8x4x8xf32> to vector<8x32xf32>
    %22 = arith.truncf %21 : vector<8x32xf32> to vector<8x32xbf16>
    %c0_12 = arith.constant 0 : index
    %c0_13 = arith.constant 0 : index
    %23 = vector.load %arg5[%c0_12, %c0_13] : memref<32x32xbf16, #tpu.memory_space<vmem>>, vector<32x32xbf16>
    %cst_14 = arith.constant dense<0.000000e+00> : vector<8x32xf32>
    %24 = tpu.matmul %22, %23, %cst_14 {dimension_numbers = #tpu.dot_dimension_numbers<[1], [0], [0], [1], [0, 0, 1, 1], [], []>} : vector<8x32xbf16>, vector<32x32xbf16>, vector<8x32xf32> -> vector<8x32xf32>
    %c0_15 = arith.constant 0 : index
    %c0_16 = arith.constant 0 : index
    %25 = vector.load %arg6[%c0_15, %c0_16] : memref<1x32xf32, #tpu.memory_space<vmem>>, vector<1x32xf32>
    %26 = vector.broadcast %25 : vector<1x32xf32> to vector<8x32xf32>
    %27 = arith.addf %24, %26 : vector<8x32xf32>
    %28 = vector.shape_cast %27 : vector<8x32xf32> to vector<1x8x32xf32>
    %c0_17 = arith.constant 0 : index
    %c0_18 = arith.constant 0 : index
    %c0_19 = arith.constant 0 : index
    %29 = vector.load %arg7[%c0_17, %c0_18, %c0_19] : memref<1x8x32xf32, #tpu.memory_space<vmem>>, vector<1x8x32xf32>
    tpu.vector_store %arg7[%c0_17, %c0_18, %c0_19], %28 {strides = array<i32>} : memref<1x8x32xf32, #tpu.memory_space<vmem>>, vector<1x8x32xf32>,
    return
  }
  func.func @transform_0(%arg0: i32, %arg1: i32) -> (i32, i32, i32) {
    %c0_i32 = arith.constant 0 : i32
    %c0_i32_0 = arith.constant 0 : i32
    %c0_i32_1 = arith.constant 0 : i32
    return %arg0, %c0_i32, %c0_i32_0 : i32, i32, i32
  }
  func.func @transform_1(%arg0: i32, %arg1: i32) -> (i32, i32) {
    %c0_i32 = arith.constant 0 : i32
    %c0_i32_0 = arith.constant 0 : i32
    %c0_i32_1 = arith.constant 0 : i32
    return %c0_i32, %c0_i32_0 : i32, i32
  }
  func.func @transform_2(%arg0: i32, %arg1: i32) -> (i32, i32) {
    %c0_i32 = arith.constant 0 : i32
    %c0_i32_0 = arith.constant 0 : i32
    %c0_i32_1 = arith.constant 0 : i32
    return %c0_i32, %c0_i32_0 : i32, i32
  }
  func.func @transform_3(%arg0: i32, %arg1: i32) -> (i32, i32) {
    %c0_i32 = arith.constant 0 : i32
    %c0_i32_0 = arith.constant 0 : i32
    %c0_i32_1 = arith.constant 0 : i32
    return %c0_i32, %c0_i32_0 : i32, i32
  }
  func.func @transform_4(%arg0: i32, %arg1: i32) -> (i32, i32) {
    %c0_i32 = arith.constant 0 : i32
    %c0_i32_0 = arith.constant 0 : i32
    %c0_i32_1 = arith.constant 0 : i32
    return %c0_i32, %c0_i32_0 : i32, i32
  }
  func.func @transform_5(%arg0: i32, %arg1: i32) -> (i32, i32, i32) {
    %c0_i32 = arith.constant 0 : i32
    %c0_i32_0 = arith.constant 0 : i32
    return %arg0, %arg1, %c0_i32 : i32, i32, i32
  }
}

</mosaic_0001>

<bundles_post_ra>
// kernel: tpu_custom_call.1
= control target key start
LH: loop header
LB: loop body
LE: loop exit
PB: predicated region body
PF: predicated region fallthrough
CT: control target
= control target key end

     0   :  { %10 = vsyncpa [#allocation6], 0  ;;  %s2119_s0 = inlined_call_operand.hbm [shape: bf16[2,8,32], index: 0, kind: input, shape index: {}]   ;;  %s2120_s1 = inlined_call_operand.hbm [shape: bf16[32,96], index: 1, kind: input, shape index: {}]   ;;  %s2121_s2 = inlined_call_operand.vmem [shape: f32[1,96], index: 2, kind: input, shape index: {}]   ;;  %s2122_s3 = inlined_call_operand.hbm [shape: bf16[32,32], index: 3, kind: input, shape index: {}]   ;;  %s2123_s4 = inlined_call_operand.vmem [shape: f32[1,32], index: 4, kind: input, shape index: {}]   ;;  %s2124_s5 = inlined_call_operand.hbm [shape: f32[2,8,32], index: 5, kind: output, shape index: {}]  }
   0x1   :  { %12 = vsyncpa [#allocation6 + $0x1], 0 }
   0x2   :  { %13 = vsyncpa [#allocation9], 0 }
   0x3   :  { %14 = vsyncpa [#allocation7], 0 }
   0x4   :  { %16 = vsyncpa [#allocation7 + $0x1], 0  ;;  %s1756_s18 = smov 0   ;;  %s1758_s19 = smov 0  }
   0x5   :  { %s1760_s20 = smov 0   ;;  %s1762_s21 = smov 0  }
   0x6   :  { %s1764_s22 = smov 0   ;;  %s1766_s23 = smov 0  }
   0x7 LB: > { %s1346_s24 = sadd.s32 4294967295, %s1710_s23   ;;  %p1348_p0 = scmp.ge.s32.totalorder %s1710_s23, 1  ;;  %s1710_s23 = sphi %s1766_s23, %s22_s23   ;;  %s1706_s22 = sphi %s1764_s22, %s2134_s22   ;;  %s1702_s21 = sphi %s1762_s21, %s2133_s21   ;;  %s1698_s20 = sphi %s1760_s20, %s2132_s20   ;;  %s1694_s19 = sphi %s1758_s19, %s2131_s19   ;;  %s1690_s18 = sphi %s1756_s18, %s2130_s18  }
   0x8   : > { %p1790_p1 = scmp.eq.s32.totalorder %s1346_s24, 0  ;;  %p177_p2 = scmp.lt.s32.totalorder %s1710_s23, 3 }
   0x9   : > { %s188_s28 = sshll.u32 %s2120_s1, 4  ;;  %s1712_s30 = smov [#allocation8]   ;;  %s189_s28 = int_to_ptr.hbm [resolvable:$true] %s188_s28 }
   0xa   : > { %p1798_p3 = pnand %p1348_p0, %p177_p2  ;;  %s190_s6 = sshll.u32 %s1712_s30, 4  ;;  %s191_s6 = int_to_ptr.vmem [resolvable:$true] %s190_s6 }
   0xb   : > { %p1351_p6 = scmp.ge.s32.totalorder %s1710_s23, 2  ;;  %s205_s9 = sshll.u32 %s2122_s3, 4  ;;  %s206_s9 = int_to_ptr.hbm [resolvable:$true] %s205_s9 }
   0xc   : > { %p1405_p4 = pneg %p1798_p3  ;;  %s1713_s10 = smov 64  }
   0xd   : > { %s1714_s11 = smov 4   ;;  %s1715_s12 = smov [#allocation10]  }
   0xe   : > { %p1406_p5 = pnand %p1405_p4, %p1790_p1  ;;  %s207_s13 = sshll.u32 %s1715_s12, 4  ;;  %s208_s13 = int_to_ptr.vmem [resolvable:$true] %s207_s13 }
   0xf   : > { %s34_s14 = sadd.s32 1, %s1706_s22  ;;  %s1347_s15 = sadd.s32 4294967294, %s1710_s23  }
  0x10   : > { %1408 = dma.hbm_to_vmem [thread:$0]  (!%p1406_p5), %s189_s28, 256, %s191_s6, [#allocation9], %s1713_s10, %s1713_s10, %s1714_s11  }
  0x11   : > { %1411 = dma.hbm_to_vmem [thread:$0]  (!%p1406_p5), %s206_s9, 256, %s208_s13, [#allocation9], %s1713_s10, %s1713_s10, %s1714_s11  }
  0x12   : > { %p36_p7 = scmp.ge.s32.totalorder %s34_s14, 2  ;;  %s41_s16 = sadd.s32 1, %s1698_s20 }
  0x13   : > { %p48_p8 = scmp.ne.s32.totalorder %s1698_s20, %s1694_s19  ;;  %p49_p9 = scmp.eq.s32.totalorder %s1710_s23, 0 }
  0x14   : > { %s2136_s14 = smov (%p36_p7, %s34_s14), 0  ;;  %p54_p10 = scmp.ne.s32.totalorder %s1694_s19, %s1690_s18 }
  0x15   : > { %s38_s17 = ssub.s32 %s1706_s22, %s2136_s14  ;;  %p164_p11 = scmp.eq.s32.totalorder %s1346_s24, 1 }
  0x16   : > { %p39_p12 = scmp.eq.s32.totalorder %s38_s17, 0  ;;  %p1826_p13 = por %p1790_p1, %p54_p10 }
  0x17   : > { %p1830_p0 = por %p164_p11, %p48_p8  ;;  %p170_p2 = scmp.eq.s32.totalorder %s1347_s15, 1 }
  0x18   : > { %s1835_s28 = scalar_select %p39_p12, %s1698_s20, %s41_s16  }
  0x19   : > { %p50_p4 = por %p49_p9, %p48_p8  ;;  %p1837_p5 = por %p170_p2, %p54_p10 }
  0x1a   : > { %s224_s6 = sand.u32 1, %s1698_s20   ;;  %s1353_s24 = sshll.u32 %s1706_s22, 2 }
  0x1b   : > { %p1422_p7 = scmp.lt.s32.totalorder %s1710_s23, 2  ;;  %s1352_s7 = sshll.u32 %s224_s6, 2 }
  0x1c   : > { %s232_s10 = scalar_lea.hbm %s2119_s0, %s1353_s24  ;;  %s228_s12 = scalar_lea.vmem [#allocation5], %s1352_s7 }
  0x1d   : > { %s234_s11 = sshll.u32 %s232_s10, 4  ;;  %s236_s13 = sshll.u32 %s228_s12, 4  ;;  %s235_s11 = int_to_ptr.hbm [resolvable:$true] %s234_s11  ;;  %s237_s13 = int_to_ptr.vmem [resolvable:$true] %s236_s13 }
  0x1e   : > { %p1413_p11 = pnand %p1422_p7, %p50_p4  ;;  %s225_s15 = scalar_lea.sflag [#allocation6], %s224_s6 }
  0x1f   : > { %245 = sbr.rel (%p1798_p3) target bundleno = 1295 (0x50f), region = 40  ;;  %s1850_s16 = sand.u32 (!%p1798_p3), 1, %s1694_s19  }
  0x20   : > { %1415 = dma.hbm_to_vmem [thread:$0]  (!%p1413_p11), %s235_s11, 64, %s237_s13, %s225_s15  }
  0x21   : > { %s1355_s17 = sshll.u32 (!%p1798_p3), %s1850_s16, 2  ;;  %s248_s8 = scalar_lea.sflag (!%p1798_p3), [#allocation6], %s1850_s16 }
  0x22   : > { %s251_s24 = scalar_lea.vmem (!%p1798_p3), [#allocation5], %s1355_s17 }
  0x24   : > { %1677 = dma.done.wait (%p1826_p13), %s248_s8, 64  }
  0x25   : > { %1679 = vsyncadd (%p1826_p13), %s248_s8, 4294967232 }
  0x26   : > { %1681 = dma.done.wait (%p1790_p1), [#allocation9], 512  }
  0x27   : > { %1683 = vsyncadd (%p1790_p1), [#allocation9], 4294966784  ;;  %v1390_v0 = vld [vmem:[#allocation8 + $0x8] sm:$0xff]  ;;  %v1389_v1 = vld [vmem:[#allocation8] sm:$0xff]  ;;  %vm315_vm0 = vcmask 261120   ;;  %s1716_s26 = smov 104  }
  0x28   : > { %325 = vmatpush.bf16.msra.mxu0 %v1390_v0  ;;  %v294_v2 = vld [vmem:[%s251_s24] sm:$0xf]  ;;  %v1516_v3 = vld [vmem:[%s2121_s2] ss:$0 sm:$0xff]  ;;  %s1717_s7 = smov 120   ;;  %s1718_s25 = smov 112  }
  0x29   : > { %v1719_v7 = vmov 1983009808   ;;  %vm343_vm1 = vcmask 1047556   ;;  %s1720_s9 = smov 96   ;;  %v1721_v17 = vmov 1934713408  }
  0x2a   : > { %v348_v8 = vunpack.c.l.s4 %v1719_v7  ;;  %v372_v18 = vunpack.c.l.s4 %v1721_v17  ;;  %vm457_vm2 = vcmask 60416   ;;  %s1722_s10 = smov 64   ;;  %vm862_vm3 = vcmask 1043456   ;;  %s1723_s11 = smov 24  }
  0x2b   : > { %vm858_vm4 = vcmask 64512   ;;  %s1724_s12 = smov 16   ;;  %s1725_s13 = smov 8   ;;  %vm1188_vm5 = vcmask 130048   ;;  %vm1190_vm6 = vcmask 195584  }
  0x2c   : > { %326 = vmatpush.bf16.msra.mxu0 %v1389_v1  ;;  %v1868_v14 = vunpack.c.0.s8 %v348_v8  ;;  %v1875_v23 = vunpack.c.0.s8 %v372_v18  ;;  %s1386_s15 = sshll.u32 %s1702_s21, 3  ;;  %s1358_s17 = sshll.u32 %s1850_s16, 3 }
  0x2d   : > { %s1243_s29 = scalar_lea.hbm %s2124_s5, %s1386_s15  ;;  %s1232_s21 = scalar_lea.sflag [#allocation7], %s1850_s16 }
  0x2e   : > { %s1644_s15 = scalar_lea.hbm %s2124_s5, 16 }
  0x2f   : > { %1367 = vmatmul.msk.bf16.vlgmr.msra.gmra.mxu0 %vm315_vm0, %v294_v2 }
  0xac   : > { %v328_v4 = vpop.f32.mrf.mxu0 }
  0xad   : > { %v329_v5 = vadd.f32 %v1516_v3, %v328_v4 }
  0xaf   : > { %339 = vrot.lane.b32.xlu1 %v329_v5, %s1716_s26  ;;  %333 = vrot.lane.b32.xlu0 %v329_v5, %s1717_s7  ;;  %v345_v20 = vrot.slane %v329_v5, 4  ;;  %s288_s7 = scalar_lea.vmem [#allocation11], %s1358_s17 }
  0xb4   : > { %v330_v6 = vpop.f32.mrf.mxu0 }
  0xb7   : > { %336 = vrot.lane.b32.xlu0 %v329_v5, %s1718_s25  ;;  %s1245_s25 = sshll.u32 %s288_s7, 4  ;;  %s1246_s25 = int_to_ptr.vmem [resolvable:$true] %s1245_s25 }
 0x121   : > { %v340_v9 = vpop.permute.xlu1 %339  ;;  %v334_v10 = vpop.permute.xlu0 %333 }
 0x122   : > { %v355_v11 = vrot.slane %v340_v9, 4  ;;  %v357_v12 = vrot.slane %v334_v10, 4  ;;  %v1866_v13 = vpack.i.bf16 %v334_v10, %v329_v5 }
 0x124   : > { %v358_v15 = vsel %vm343_vm1, %v340_v9, %v357_v12  ;;  %1490 = vrot.lane.b32.xlu1 %v1866_v13, %s1720_s9  ;;  %v356_v16 = vsel %vm343_vm1, %v355_v11, %v334_v10 }
 0x125   : > { %v366_v19 = vperm.slane %v358_v15, %v1868_v14  ;;  %v362_v21 = vperm.slane %v356_v16, %v1868_v14 }
 0x127   : > { %v379_v27 = vrot.slane %v366_v19, 4  ;;  %v367_v30 = vrot.slane %v362_v21, 4 }
 0x129   : > { %v337_v22 = vpop.permute.xlu0 %336 }
 0x12a   : > { %v342_v24 = vrot.slane %v337_v22, 4  ;;  %v346_v25 = vsel %vm343_vm1, %v337_v22, %v345_v20  ;;  %v1878_v26 = vpack.i.bf16 %v340_v9, %v337_v22 }
 0x12b   : > { %v354_v28 = vperm.slane %v346_v25, %v1868_v14 }
 0x12c   : > { %v344_v29 = vsel %vm343_vm1, %v342_v24, %v329_v5  ;;  %1495 = vrot.lane.b32.xlu2 %v1878_v26, %s1720_s9  ;;  %s1247_s9 = sshll.u32 %s1243_s29, 4  ;;  %s1248_s9 = int_to_ptr.hbm [resolvable:$true] %s1247_s9 }
 0x12d   : > { %v350_v31 = vperm.slane %v344_v29, %v1868_v14  ;;  %v380_v32 = vsel %vm343_vm1, %v379_v27, %v354_v28  ;;  %v381_v33 = vrot.slane %v354_v28, 4 }
 0x12e   : > { %v386_v34 = vperm.slane %v380_v32, %v1875_v23 }
 0x12f   : > { %v368_v35 = vsel %vm343_vm1, %v367_v30, %v350_v31  ;;  %v369_v36 = vrot.slane %v350_v31, 4  ;;  %v382_v37 = vsel %vm343_vm1, %v366_v19, %v381_v33 }
 0x130   : > { %v374_v38 = vperm.slane %v368_v35, %v1875_v23  ;;  %v390_v39 = vperm.slane %v382_v37, %v1875_v23  ;;  %v395_v42 = vrot.slane %v386_v34, 4 }
 0x131   : > { %v370_v40 = vsel %vm343_vm1, %v362_v21, %v369_v36 }
 0x132   : > { %v378_v41 = vperm.slane %v370_v40, %v1875_v23  ;;  %v397_v43 = vrot.slane %v390_v39, 4  ;;  %v391_v44 = vrot.slane %v374_v38, 4  ;;  %v396_v51 = vsel %vm343_vm1, 0.0, %v395_v42 }
 0x134   : > { %v393_v45 = vrot.slane %v378_v41, 4  ;;  %v398_v46 = vsel %vm343_vm1, 0.0, %v397_v43  ;;  %v410_v47 = vsel %vm343_vm1, %v397_v43, %v386_v34  ;;  %v392_v57 = vsel %vm343_vm1, 0.0, %v391_v44 }
 0x135   : > { %v414_v48 = vperm.slane %v410_v47, %v1868_v14  ;;  %v415_v49 = vrot.slane %v398_v46, 4 }
 0x136   : > { %v394_v50 = vsel %vm343_vm1, 0.0, %v393_v45  ;;  %v399_v52 = vsel %vm343_vm1, %v393_v45, %v374_v38 }
 0x137   : > { %v403_v53 = vperm.slane %v399_v52, %v1868_v14  ;;  %v404_v54 = vrot.slane %v394_v50, 4  ;;  %v416_v55 = vsel %vm343_vm1, %v415_v49, %v396_v51  ;;  %v435_v56 = vrot.slane %v414_v48, 4 }
 0x138   : > { %v420_v58 = vperm.slane %v416_v55, %v1868_v14 }
 0x139   : > { %v405_v59 = vsel %vm343_vm1, %v404_v54, %v392_v57  ;;  %v423_v60 = vrot.slane %v403_v53, 4 }
 0x13a   : > { %v409_v61 = vperm.slane %v405_v59, %v1868_v14  ;;  %v433_v62 = vrot.slane %v420_v58, 4  ;;  %v436_v63 = vsel %vm343_vm1, %v420_v58, %v435_v56 }
 0x13b   : > { %v444_v0 = vperm.slane %v436_v63, %v1875_v23 }
 0x13c   : > { %v421_v1 = vrot.slane %v409_v61, 4  ;;  %v424_v2 = vsel %vm343_vm1, %v409_v61, %v423_v60  ;;  %v434_v3 = vsel %vm343_vm1, %v433_v62, %v414_v48 }
 0x13d   : > { %v432_v4 = vperm.slane %v424_v2, %v1875_v23  ;;  %v440_v5 = vperm.slane %v434_v3, %v1875_v23  ;;  %v449_v6 = vrot.slane %v444_v0, 4 }
 0x13e   : > { %v422_v7 = vsel %vm343_vm1, %v421_v1, %v403_v53 }
 0x13f   : > { %v428_v8 = vperm.slane %v422_v7, %v1875_v23  ;;  %v445_v9 = vrot.slane %v440_v5, 4  ;;  %v450_v10 = vsel %vm343_vm1, %v449_v6, %v432_v4  ;;  %v451_v11 = vrot.slane %v432_v4, 4 }
 0x140   : > { %v455_v12 = vpack.c.bf16 %v450_v10, %v450_v10 }
 0x141   : > { %v446_v15 = vsel %vm343_vm1, %v445_v9, %v428_v8  ;;  %v447_v16 = vrot.slane %v428_v8, 4  ;;  %v452_v17 = vsel %vm343_vm1, %v444_v0, %v451_v11 }
 0x142   : > { %v453_v18 = vpack.c.bf16 %v446_v15, %v446_v15  ;;  %v456_v19 = vpack.c.bf16 %v452_v17, %v452_v17  ;;  %460 = vst.msk [vmem:[#allocation2 + $0x8] sm:$0xf] %vm457_vm2, %v455_v12 }
 0x143   : > { %v448_v20 = vsel %vm343_vm1, %v440_v5, %v447_v16 }
 0x144   : > { %v454_v21 = vpack.c.bf16 %v448_v20, %v448_v20  ;;  %461 = vst.msk [vmem:[#allocation2 + $0xc] sm:$0xf] %vm457_vm2, %v456_v19 }
 0x145   : > { %458 = vst.msk [vmem:[#allocation2] sm:$0xf] %vm457_vm2, %v453_v18 }
 0x146   : > { %459 = vst.msk [vmem:[#allocation2 + $0x4] sm:$0xf] %vm457_vm2, %v454_v21 }
 0x186   : > { %v1496_v22 = vpop.permute.xlu2 %1495 }
 0x187   : > { %v1498_v24 = vunpack.i.h.bf16 %v1496_v22  ;;  %v1497_v25 = vunpack.i.l.bf16 %v1496_v22 }
 0x189   : > { %v486_v28 = vrot.slane %v1498_v24, 4  ;;  %v474_v29 = vrot.slane %v1497_v25, 4 }
 0x196   : > { %v1491_v27 = vpop.permute.xlu1 %1490 }
 0x197   : > { %v1493_v30 = vunpack.i.h.bf16 %v1491_v27  ;;  %v1492_v31 = vunpack.i.l.bf16 %v1491_v27 }
 0x199   : > { %v488_v32 = vrot.slane %v1493_v30, 4  ;;  %v475_v33 = vsel %vm343_vm1, %v474_v29, %v1492_v31  ;;  %v476_v34 = vrot.slane %v1492_v31, 4  ;;  %v487_v35 = vsel %vm343_vm1, %v486_v28, %v1493_v30 }
 0x19a   : > { %v481_v36 = vperm.slane %v475_v33, %v1868_v14  ;;  %v493_v37 = vperm.slane %v487_v35, %v1868_v14 }
 0x19b   : > { %v477_v38 = vsel %vm343_vm1, %v1497_v25, %v476_v34  ;;  %v489_v39 = vsel %vm343_vm1, %v1498_v24, %v488_v32 }
 0x19c   : > { %v485_v40 = vperm.slane %v477_v38, %v1868_v14  ;;  %v497_v41 = vperm.slane %v489_v39, %v1868_v14  ;;  %v498_v42 = vrot.slane %v493_v37, 4  ;;  %v500_v43 = vrot.slane %v481_v36, 4 }
 0x19e   : > { %v499_v44 = vsel %vm343_vm1, %v498_v42, %v481_v36  ;;  %v501_v45 = vsel %vm343_vm1, %v493_v37, %v500_v43  ;;  %v510_v46 = vrot.slane %v497_v41, 4  ;;  %v512_v47 = vrot.slane %v485_v40, 4 }
 0x19f   : > { %v505_v48 = vperm.slane %v499_v44, %v1875_v23  ;;  %v509_v49 = vperm.slane %v501_v45, %v1875_v23 }
 0x1a0   : > { %v511_v50 = vsel %vm343_vm1, %v510_v46, %v485_v40  ;;  %v513_v51 = vsel %vm343_vm1, %v497_v41, %v512_v47 }
 0x1a1   : > { %v517_v52 = vperm.slane %v511_v50, %v1875_v23  ;;  %v521_v53 = vperm.slane %v513_v51, %v1875_v23  ;;  %v522_v54 = vrot.slane %v505_v48, 4  ;;  %v524_v55 = vrot.slane %v509_v49, 4  ;;  %v852_v49 = vld [vmem:[#allocation2 + $0x8] sm:$0xf]  ;;  %v851_v50 = vld [vmem:[#allocation2 + $0x4] sm:$0xf] }
 0x1a2   : > { %v853_v51 = vld [vmem:[#allocation2 + $0xc] sm:$0xf] }
 0x1a3   : > { %v525_v56 = vsel %vm343_vm1, 0.0, %v524_v55  ;;  %v528_v57 = vrot.slane %v521_v53, 4  ;;  %v526_v58 = vrot.slane %v517_v52, 4  ;;  %v530_v60 = vsel %vm343_vm1, %v524_v55, %v505_v48 }
 0x1a4   : > { %v535_v59 = vrot.slane %v525_v56, 4  ;;  %v523_v61 = vsel %vm343_vm1, 0.0, %v522_v54  ;;  %v534_v63 = vperm.slane %v530_v60, %v1868_v14 }
 0x1a5   : > { %v529_v62 = vsel %vm343_vm1, 0.0, %v528_v57  ;;  %v541_v0 = vsel %vm343_vm1, %v528_v57, %v517_v52  ;;  %v527_v4 = vsel %vm343_vm1, 0.0, %v526_v58 }
 0x1a6   : > { %v536_v1 = vsel %vm343_vm1, %v535_v59, %v523_v61  ;;  %v545_v2 = vperm.slane %v541_v0, %v1868_v14  ;;  %v546_v3 = vrot.slane %v529_v62, 4  ;;  %v554_v6 = vrot.slane %v534_v63, 4 }
 0x1a7   : > { %v540_v5 = vperm.slane %v536_v1, %v1868_v14 }
 0x1a8   : > { %v547_v7 = vsel %vm343_vm1, %v546_v3, %v527_v4  ;;  %v566_v8 = vrot.slane %v545_v2, 4 }
 0x1a9   : > { %v551_v9 = vperm.slane %v547_v7, %v1868_v14  ;;  %v555_v10 = vsel %vm343_vm1, %v540_v5, %v554_v6  ;;  %v552_v11 = vrot.slane %v540_v5, 4 }
 0x1aa   : > { %v563_v12 = vperm.slane %v555_v10, %v1875_v23 }
 0x1ab   : > { %v567_v15 = vsel %vm343_vm1, %v551_v9, %v566_v8  ;;  %v553_v16 = vsel %vm343_vm1, %v552_v11, %v534_v63  ;;  %v564_v17 = vrot.slane %v551_v9, 4 }
 0x1ac   : > { %v575_v18 = vperm.slane %v567_v15, %v1875_v23  ;;  %v582_v19 = vrot.slane %v563_v12, 4  ;;  %v559_v20 = vperm.slane %v553_v16, %v1875_v23 }
 0x1ad   : > { %v565_v21 = vsel %vm343_vm1, %v564_v17, %v545_v2 }
 0x1ae   : > { %v583_v22 = vsel %vm343_vm1, %v575_v18, %v582_v19  ;;  %v571_v24 = vperm.slane %v565_v21, %v1875_v23  ;;  %v578_v25 = vrot.slane %v559_v20, 4  ;;  %v580_v27 = vrot.slane %v575_v18, 4 }
 0x1af   : > { %680 = vxpose.xlu1.b32.start.end [1/1] (short) (narrow) %v583_v22, 8 }
 0x1b0   : > { %v579_v28 = vsel %vm343_vm1, %v571_v24, %v578_v25  ;;  %v581_v29 = vsel %vm343_vm1, %v580_v27, %v563_v12  ;;  %v576_v30 = vrot.slane %v571_v24, 4 }
 0x1b1   : > { %v1499_v31 = vpack.i.bf16 %v581_v29, %v579_v28 }
 0x1b2   : > { %v577_v32 = vsel %vm343_vm1, %v576_v30, %v559_v20 }
 0x1b3   : > { %1500 = vxpose.xlu0.b32.start.end [1/1] (short) (narrow) %v1499_v31, 8  ;;  %584 = vxpose.xlu2.b32.start.end [1/1] (short) (narrow) %v577_v32, 8 }
 0x21c   : > { %1507 = vrot.lane.b32.xlu2 %v1866_v13, %s1722_s10 }
 0x221   : > { %1512 = vrot.lane.b32.xlu0 %v1878_v26, %s1722_s10  ;;  %v850_v26 = vld [vmem:[#allocation2] sm:$0xf]  ;;  %s1638_s10 = sshra.s32 %s1248_s9, 4  ;;  %s1639_s10 = int_to_ptr.hbm [resolvable:$true] %s1638_s10 }
 0x222   : > { %p1645_p9 = scmp.lt.s32.totalorder %s1639_s10, %s2124_s5 }
 0x24c   : > { %v600_v33 = vpop.trf.xlu2 }
 0x24d   : > { %v712_v34 = vpack.c.bf16 %v600_v33, %v600_v33 }
 0x24f   : > { %716 = vst.msk [vmem:[#allocation3] sm:$0xf] %vm457_vm2, %v712_v34 }
 0x253   : > { %v696_v35 = vpop.trf.xlu1 }
 0x254   : > { %v715_v36 = vpack.c.bf16 %v696_v35, %v696_v35 }
 0x256   : > { %719 = vst.msk [vmem:[#allocation3 + $0xc] sm:$0xf] %vm457_vm2, %v715_v36  ;;  %v854_v37 = vld [vmem:[#allocation3] sm:$0xf] }
 0x257   : > { %v1501_v38 = vpop.trf.xlu0  ;;  %v864_v39 = vsel %vm862_vm3, %v854_v37, 0 }
 0x258   : > { %v1505_v40 = vunpack.i.h.bf16 %v1501_v38  ;;  %v1502_v41 = vunpack.i.l.bf16 %v1501_v38  ;;  %873 = vmatpush.bf16.msra.mxu1 %v864_v39 }
 0x25a   : > { %v714_v13 = vpack.c.bf16 %v1505_v40, %v1505_v40  ;;  %v713_v42 = vpack.c.bf16 %v1502_v41, %v1502_v41 }
 0x25b   : > { %1368 = vmatmul.msk.bf16.vlgmr.msra.gmra.mxu1 %vm858_vm4, %v850_v26 }
 0x25c   : > { %718 = vst.msk [vmem:[#allocation3 + $0x8] sm:$0xf] %vm457_vm2, %v714_v13 }
 0x25d   : > { %717 = vst.msk [vmem:[#allocation3 + $0x4] sm:$0xf] %vm457_vm2, %v713_v42  ;;  %v857_v43 = vld [vmem:[#allocation3 + $0xc] sm:$0xf] }
 0x25e   : > { %v921_v44 = vsel %vm862_vm3, %v857_v43, 0 }
 0x25f   : > { %930 = vmatpush.bf16.msrb.mxu1 %v921_v44 }
 0x263   : > { %v856_v45 = vld [vmem:[#allocation3 + $0x8] sm:$0xf] }
 0x264   : > { %v855_v46 = vld [vmem:[#allocation3 + $0x4] sm:$0xf]  ;;  %v902_v47 = vsel %vm862_vm3, %v856_v45, 0 }
 0x265   : > { %v883_v48 = vsel %vm862_vm3, %v855_v46, 0  ;;  %911 = vmatpush.bf16.msra.mxu3 %v902_v47 }
 0x266   : > { %892 = vmatpush.bf16.msra.mxu2 %v883_v48 }
 0x268   : > { %1370 = vmatmul.msk.bf16.vlgmr.msra.gmra.mxu3 %vm858_vm4, %v852_v49 }
 0x269   : > { %1369 = vmatmul.msk.bf16.vlgmr.msra.gmra.mxu2 %vm858_vm4, %v851_v50 }
 0x26b   : > { %1371 = vmatmul.msk.bf16.vlgmr.msrb.gmra.mxu1 %vm858_vm4, %v853_v51 }
 0x276   : > { %v1508_v52 = vpop.permute.xlu2 %1507 }
 0x277   : > { %v1510_v53 = vunpack.i.h.bf16 %v1508_v52  ;;  %v1509_v54 = vunpack.i.l.bf16 %v1508_v52 }
 0x279   : > { %v746_v56 = vrot.slane %v1510_v53, 4  ;;  %v734_v57 = vrot.slane %v1509_v54, 4 }
 0x293   : > { %v1513_v55 = vpop.permute.xlu0 %1512 }
 0x294   : > { %v1515_v58 = vunpack.i.h.bf16 %v1513_v55  ;;  %v1514_v59 = vunpack.i.l.bf16 %v1513_v55 }
 0x296   : > { %v744_v60 = vrot.slane %v1515_v58, 4  ;;  %v732_v61 = vrot.slane %v1514_v59, 4  ;;  %v735_v62 = vsel %vm343_vm1, %v1514_v59, %v734_v57  ;;  %v747_v63 = vsel %vm343_vm1, %v1515_v58, %v746_v56 }
 0x297   : > { %v743_v0 = vperm.slane %v735_v62, %v1868_v14  ;;  %v755_v1 = vperm.slane %v747_v63, %v1868_v14 }
 0x298   : > { %v733_v2 = vsel %vm343_vm1, %v732_v61, %v1509_v54  ;;  %v745_v3 = vsel %vm343_vm1, %v744_v60, %v1510_v53 }
 0x299   : > { %v739_v4 = vperm.slane %v733_v2, %v1868_v14  ;;  %v751_v5 = vperm.slane %v745_v3, %v1868_v14  ;;  %v768_v6 = vrot.slane %v755_v1, 4  ;;  %v770_v7 = vrot.slane %v743_v0, 4 }
 0x29b   : > { %v756_v8 = vrot.slane %v751_v5, 4  ;;  %v758_v9 = vrot.slane %v739_v4, 4  ;;  %v769_v10 = vsel %vm343_vm1, %v768_v6, %v743_v0  ;;  %v771_v11 = vsel %vm343_vm1, %v755_v1, %v770_v7 }
 0x29c   : > { %v775_v12 = vperm.slane %v769_v10, %v1875_v23  ;;  %v779_v15 = vperm.slane %v771_v11, %v1875_v23 }
 0x29d   : > { %v757_v16 = vsel %vm343_vm1, %v756_v8, %v739_v4  ;;  %v759_v17 = vsel %vm343_vm1, %v751_v5, %v758_v9 }
 0x29e   : > { %v763_v18 = vperm.slane %v757_v16, %v1875_v23  ;;  %v767_v19 = vperm.slane %v759_v17, %v1875_v23  ;;  %v784_v20 = vrot.slane %v775_v12, 4  ;;  %v786_v21 = vrot.slane %v779_v15, 4 }
 0x2a0   : > { %v780_v22 = vrot.slane %v763_v18, 4  ;;  %v782_v24 = vrot.slane %v767_v19, 4  ;;  %v787_v25 = vsel %vm343_vm1, 0.0, %v786_v21  ;;  %v799_v27 = vsel %vm343_vm1, %v786_v21, %v775_v12 }
 0x2a1   : > { %v804_v28 = vrot.slane %v787_v25, 4  ;;  %v785_v30 = vsel %vm343_vm1, 0.0, %v784_v20  ;;  %v803_v32 = vperm.slane %v799_v27, %v1868_v14 }
 0x2a2   : > { %v783_v29 = vsel %vm343_vm1, 0.0, %v782_v24  ;;  %v788_v31 = vsel %vm343_vm1, %v782_v24, %v763_v18  ;;  %v781_v36 = vsel %vm343_vm1, 0.0, %v780_v22 }
 0x2a3   : > { %v792_v33 = vperm.slane %v788_v31, %v1868_v14  ;;  %v793_v34 = vrot.slane %v783_v29, 4  ;;  %v805_v35 = vsel %vm343_vm1, %v804_v28, %v785_v30  ;;  %v824_v38 = vrot.slane %v803_v32, 4 }
 0x2a4   : > { %v809_v37 = vperm.slane %v805_v35, %v1868_v14 }
 0x2a5   : > { %v794_v39 = vsel %vm343_vm1, %v793_v34, %v781_v36  ;;  %v812_v40 = vrot.slane %v792_v33, 4 }
 0x2a6   : > { %v798_v41 = vperm.slane %v794_v39, %v1868_v14  ;;  %v822_v13 = vrot.slane %v809_v37, 4  ;;  %v825_v42 = vsel %vm343_vm1, %v809_v37, %v824_v38 }
 0x2a7   : > { %v833_v26 = vperm.slane %v825_v42, %v1875_v23 }
 0x2a8   : > { %v810_v43 = vrot.slane %v798_v41, 4  ;;  %v813_v44 = vsel %vm343_vm1, %v798_v41, %v812_v40  ;;  %v823_v45 = vsel %vm343_vm1, %v822_v13, %v803_v32 }
 0x2a9   : > { %v821_v46 = vperm.slane %v813_v44, %v1875_v23  ;;  %v829_v47 = vperm.slane %v823_v45, %v1875_v23  ;;  %v838_v48 = vrot.slane %v833_v26, 4 }
 0x2aa   : > { %v811_v49 = vsel %vm343_vm1, %v810_v43, %v792_v33 }
 0x2ab   : > { %v817_v50 = vperm.slane %v811_v49, %v1875_v23  ;;  %v834_v51 = vrot.slane %v829_v47, 4  ;;  %v839_v52 = vsel %vm343_vm1, %v838_v48, %v821_v46  ;;  %v840_v53 = vrot.slane %v821_v46, 4 }
 0x2ac   : > { %v844_v54 = vpack.c.bf16 %v839_v52, %v839_v52 }
 0x2ad   : > { %v835_v55 = vsel %vm343_vm1, %v834_v51, %v817_v50  ;;  %v836_v56 = vrot.slane %v817_v50, 4  ;;  %v841_v57 = vsel %vm343_vm1, %v833_v26, %v840_v53 }
 0x2ae   : > { %v842_v58 = vpack.c.bf16 %v835_v55, %v835_v55  ;;  %v845_v59 = vpack.c.bf16 %v841_v57, %v841_v57  ;;  %848 = vst.msk [vmem:[#allocation4 + $0x8] sm:$0xf] %vm457_vm2, %v844_v54 }
 0x2af   : > { %v837_v60 = vsel %vm343_vm1, %v829_v47, %v836_v56 }
 0x2b0   : > { %v843_v61 = vpack.c.bf16 %v837_v60, %v837_v60  ;;  %849 = vst.msk [vmem:[#allocation4 + $0xc] sm:$0xf] %vm457_vm2, %v845_v59 }
 0x2b1   : > { %846 = vst.msk [vmem:[#allocation4] sm:$0xf] %vm457_vm2, %v842_v58 }
 0x2b2   : > { %847 = vst.msk [vmem:[#allocation4 + $0x4] sm:$0xf] %vm457_vm2, %v843_v61 }
 0x2b5   : > { %v978_v62 = vld [vmem:[#allocation4 + $0x8] sm:$0xf] }
 0x2b6   : > { %v1022_v63 = vsel %vm862_vm3, %v978_v62, 0 }
 0x2b7   : > { %1031 = vmatpush.bf16.msrb.mxu0 %v1022_v63  ;;  %v979_v0 = vld [vmem:[#allocation4 + $0xc] sm:$0xf] }
 0x2b8   : > { %v976_v1 = vld [vmem:[#allocation4] sm:$0xf]  ;;  %v1041_v2 = vsel %vm862_vm3, %v979_v0, 0 }
 0x2b9   : > { %v984_v3 = vsel %vm862_vm3, %v976_v1, 0  ;;  %1050 = vmatpush.bf16.msra.mxu1 %v1041_v2  ;;  %v977_v4 = vld [vmem:[#allocation4 + $0x4] sm:$0xf] }
 0x2ba   : > { %993 = vmatpush.bf16.msrb.mxu2 %v984_v3  ;;  %v1003_v5 = vsel %vm862_vm3, %v977_v4, 0 }
 0x2bb   : > { %1012 = vmatpush.bf16.msrb.mxu3 %v1003_v5 }
 0x2d8   : > { %v875_v6 = vpop.f32.mrf.mxu1 }
 0x2d9   : > { %v936_v7 = vsel %vm858_vm4, %v875_v6, -inf }
 0x2da   : > { %937 = vmax.xlane.f32.xlu1 %v936_v7 }
 0x2e0   : > { %v877_v8 = vpop.f32.mrf.mxu1 }
 0x2e8   : > { %v932_v9 = vpop.f32.mrf.mxu1 }
 0x2e9   : > { %v945_v10 = vsel %vm858_vm4, %v932_v9, -inf }
 0x2ea   : > { %946 = vmax.xlane.f32.xlu1 %v945_v10 }
 0x2eb   : > { %v913_v11 = vpop.f32.mrf.mxu3 }
 0x2ec   : > { %v894_v12 = vpop.f32.mrf.mxu2  ;;  %v942_v15 = vsel %vm858_vm4, %v913_v11, -inf }
 0x2ed   : > { %943 = vmax.xlane.f32.xlu0 %v942_v15  ;;  %v939_v16 = vsel %vm858_vm4, %v894_v12, -inf }
 0x2ee   : > { %940 = vmax.xlane.f32.xlu2 %v939_v16 }
 0x2f0   : > { %v934_v17 = vpop.f32.mrf.mxu1 }
 0x2f3   : > { %v915_v18 = vpop.f32.mrf.mxu3 }
 0x2f4   : > { %v896_v19 = vpop.f32.mrf.mxu2 }
 0x34d   : > { %v938_v20 = vpop.xlane.xlu1 %937 }
 0x34e   : > { %v948_v21 = vsub.f32 %v875_v6, %v938_v20 }
 0x350   : > { %v952_v22 = vmul.f32 1.442695, %v948_v21 }
 0x352   : > { %1518 = vpow2.f32 %v952_v22 }
 0x358   : > { %v1519_v24 = vpop.eup %1518 }
 0x359   : > { %v960_v25 = vsel %vm858_vm4, %v1519_v24, 0.0  ;;  %v972_v27 = vpack.c.bf16 %v1519_v24, %v1519_v24 }
 0x35a   : > { %961 = vadd.xlane.f32.xlu1 %v960_v25 }
 0x35b   : > { %1372 = vmatmul.msk.bf16.vlgmr.msrb.gmra.mxu2 %vm858_vm4, %v972_v27 }
 0x35d   : > { %v947_v28 = vpop.xlane.xlu1 %946 }
 0x35e   : > { %v951_v29 = vsub.f32 %v932_v9, %v947_v28 }
 0x360   : > { %v958_v30 = vmul.f32 1.442695, %v951_v29  ;;  %v944_v31 = vpop.xlane.xlu0 %943 }
 0x361   : > { %v950_v32 = vsub.f32 %v913_v11, %v944_v31  ;;  %v941_v33 = vpop.xlane.xlu2 %940 }
 0x362   : > { %1520 = vpow2.f32 %v958_v30  ;;  %v949_v34 = vsub.f32 %v894_v12, %v941_v33 }
 0x363   : > { %v956_v35 = vmul.f32 1.442695, %v950_v32 }
 0x364   : > { %v954_v36 = vmul.f32 1.442695, %v949_v34 }
 0x365   : > { %1522 = vpow2.f32 %v956_v35 }
 0x366   : > { %1524 = vpow2.f32 %v954_v36 }
 0x368   : > { %v1521_v37 = vpop.eup %1520 }
 0x369   : > { %v975_v38 = vpack.c.bf16 %v1521_v37, %v1521_v37  ;;  %v969_v43 = vsel %vm858_vm4, %v1521_v37, 0.0 }
 0x36b   : > { %v1523_v39 = vpop.eup %1522  ;;  %1375 = vmatmul.msk.bf16.vlgmr.msra.gmra.mxu1 %vm858_vm4, %v975_v38 }
 0x36c   : > { %v1525_v40 = vpop.eup %1524  ;;  %v966_v41 = vsel %vm858_vm4, %v1523_v39, 0.0  ;;  %v974_v13 = vpack.c.bf16 %v1523_v39, %v1523_v39 }
 0x36d   : > { %v963_v42 = vsel %vm858_vm4, %v1525_v40, 0.0  ;;  %967 = vadd.xlane.f32.xlu1 %v966_v41  ;;  %v973_v26 = vpack.c.bf16 %v1525_v40, %v1525_v40 }
 0x36e   : > { %964 = vadd.xlane.f32.xlu2 %v963_v42  ;;  %1374 = vmatmul.msk.bf16.vlgmr.msrb.gmra.mxu0 %vm858_vm4, %v974_v13 }
 0x36f   : > { %1373 = vmatmul.msk.bf16.vlgmr.msrb.gmra.mxu3 %vm858_vm4, %v973_v26 }
 0x375   : > { %970 = vadd.xlane.f32.xlu1 %v969_v43 }
 0x3cd   : > { %v962_v44 = vpop.xlane.xlu1 %961 }
 0x3ce   : > { %1526 = vrcp.f32 %v962_v44 }
 0x3d4   : > { %v1527_v51 = vpop.eup %1526 }
 0x3de   : > { %v995_v45 = vpop.f32.mrf.mxu2 }
 0x3df   : > { %v1060_v53 = vmul.f32 %v1527_v51, %v995_v45 }
 0x3e0   : > { %v968_v46 = vpop.xlane.xlu1 %967 }
 0x3e1   : > { %1528 = vrcp.f32 %v968_v46  ;;  %v965_v50 = vpop.xlane.xlu2 %964  ;;  %v1067_v58 = vrot.slane %v1060_v53, 4 }
 0x3e6   : > { %v997_v47 = vpop.f32.mrf.mxu2 }
 0x3e7   : > { %v1529_v52 = vpop.eup %1528 }
 0x3e8   : > { %v971_v48 = vpop.xlane.xlu1 %970  ;;  %v1052_v49 = vpop.f32.mrf.mxu1 }
 0x3e9   : > { %1530 = vrcp.f32 %v971_v48 }
 0x3ea   : > { %1532 = vrcp.f32 %v965_v50 }
 0x3eb   : > { %v1033_v54 = vpop.f32.mrf.mxu0 }
 0x3ec   : > { %v1062_v55 = vmul.f32 %v1529_v52, %v1033_v54 }
 0x3ee   : > { %v1064_v56 = vrot.slane %v1062_v55, 4  ;;  %v1068_v62 = vsel %vm343_vm1, %v1062_v55, %v1067_v58 }
 0x3ef   : > { %v1531_v57 = vpop.eup %1530  ;;  %v1076_v5 = vperm.slane %v1068_v62, %v1868_v14 }
 0x3f0   : > { %v1063_v59 = vmul.f32 %v1531_v57, %v1052_v49  ;;  %v1066_v60 = vsel %vm343_vm1, %v1064_v56, %v1060_v53  ;;  %v1054_v61 = vpop.f32.mrf.mxu1  ;;  %v1533_v63 = vpop.eup %1532 }
 0x3f1   : > { %v1072_v1 = vperm.slane %v1066_v60, %v1868_v14  ;;  %v1103_v11 = vrot.slane %v1076_v5, 4 }
 0x3f2   : > { %v1077_v0 = vrot.slane %v1063_v59, 4  ;;  %v1014_v2 = vpop.f32.mrf.mxu3 }
 0x3f3   : > { %v1061_v3 = vmul.f32 %v1533_v63, %v1014_v2  ;;  %v1035_v4 = vpop.f32.mrf.mxu0  ;;  %v1091_v8 = vrot.slane %v1072_v1, 4  ;;  %v1392_v63 = vld [vmem:[#allocation10 + $0x8] sm:$0xff] }
 0x3f4   : > { %1223 = vmatpush.bf16.msra.mxu2 %v1392_v63 }
 0x3f5   : > { %v1078_v6 = vsel %vm343_vm1, %v1077_v0, %v1061_v3  ;;  %v1079_v7 = vrot.slane %v1061_v3, 4  ;;  %v1391_v0 = vld [vmem:[#allocation10] sm:$0xff] }
 0x3f6   : > { %v1084_v9 = vperm.slane %v1078_v6, %v1868_v14 }
 0x3f7   : > { %v1080_v10 = vsel %vm343_vm1, %v1063_v59, %v1079_v7  ;;  %v1517_v7 = vld [vmem:[%s2123_s4] ss:$0 sm:$0xff] }
 0x3f8   : > { %v1088_v12 = vperm.slane %v1080_v10, %v1868_v14  ;;  %v1089_v15 = vrot.slane %v1084_v9, 4  ;;  %v1092_v16 = vsel %vm343_vm1, %v1084_v9, %v1091_v8  ;;  %1224 = vmatpush.bf16.msra.mxu2 %v1391_v0 }
 0x3f9   : > { %v1100_v17 = vperm.slane %v1092_v16, %v1875_v23 }
 0x3fa   : > { %v1090_v18 = vsel %vm343_vm1, %v1089_v15, %v1072_v1  ;;  %v1101_v19 = vrot.slane %v1088_v12, 4  ;;  %v1104_v20 = vsel %vm343_vm1, %v1088_v12, %v1103_v11  ;;  %v1016_v21 = vpop.f32.mrf.mxu3 }
 0x3fb   : > { %v1096_v22 = vperm.slane %v1090_v18, %v1875_v23  ;;  %v1112_v24 = vperm.slane %v1104_v20, %v1875_v23  ;;  %v1115_v25 = vrot.slane %v1100_v17, 4 }
 0x3fc   : > { %v1102_v27 = vsel %vm343_vm1, %v1101_v19, %v1076_v5 }
 0x3fd   : > { %v1108_v28 = vperm.slane %v1102_v27, %v1875_v23  ;;  %v1113_v29 = vrot.slane %v1096_v22, 4  ;;  %v1116_v30 = vsel %vm343_vm1, 0.0, %v1115_v25  ;;  %v1119_v31 = vrot.slane %v1112_v24, 4 }
 0x3fe   : > { %v1121_v32 = vsel %vm343_vm1, %v1115_v25, %v1096_v22  ;;  %v1126_v33 = vrot.slane %v1116_v30, 4 }
 0x3ff   : > { %v1120_v34 = vsel %vm343_vm1, 0.0, %v1119_v31  ;;  %v1114_v35 = vsel %vm343_vm1, 0.0, %v1113_v29  ;;  %v1117_v36 = vrot.slane %v1108_v28, 4  ;;  %v1125_v37 = vperm.slane %v1121_v32, %v1868_v14 }
 0x400   : > { %v1137_v38 = vrot.slane %v1120_v34, 4  ;;  %v1127_v39 = vsel %vm343_vm1, %v1126_v33, %v1114_v35  ;;  %v1132_v40 = vsel %vm343_vm1, %v1119_v31, %v1108_v28 }
 0x401   : > { %v1118_v41 = vsel %vm343_vm1, 0.0, %v1117_v36  ;;  %v1131_v13 = vperm.slane %v1127_v39, %v1868_v14  ;;  %v1136_v42 = vperm.slane %v1132_v40, %v1868_v14  ;;  %v1145_v26 = vrot.slane %v1125_v37, 4 }
 0x402   : > { %v1138_v43 = vsel %vm343_vm1, %v1137_v38, %v1118_v41 }
 0x403   : > { %v1142_v44 = vperm.slane %v1138_v43, %v1868_v14  ;;  %v1146_v45 = vsel %vm343_vm1, %v1131_v13, %v1145_v26  ;;  %v1157_v46 = vrot.slane %v1136_v42, 4  ;;  %v1143_v47 = vrot.slane %v1131_v13, 4 }
 0x404   : > { %v1154_v48 = vperm.slane %v1146_v45, %v1875_v23 }
 0x405   : > { %v1158_v49 = vsel %vm343_vm1, %v1142_v44, %v1157_v46  ;;  %v1144_v50 = vsel %vm343_vm1, %v1143_v47, %v1125_v37  ;;  %v1155_v51 = vrot.slane %v1142_v44, 4 }
 0x406   : > { %v1166_v52 = vperm.slane %v1158_v49, %v1875_v23  ;;  %v1173_v53 = vrot.slane %v1154_v48, 4  ;;  %v1150_v54 = vperm.slane %v1144_v50, %v1875_v23 }
 0x407   : > { %v1156_v55 = vsel %vm343_vm1, %v1155_v51, %v1136_v42 }
 0x408   : > { %v1174_v14 = vsel %vm343_vm1, %v1166_v52, %v1173_v53  ;;  %v1171_v56 = vrot.slane %v1166_v52, 4  ;;  %v1162_v57 = vperm.slane %v1156_v55, %v1875_v23  ;;  %v1169_v58 = vrot.slane %v1150_v54, 4 }
 0x409   : > { %1184 = vrot.lane.b32.xlu0 %v1174_v14, %s1723_s11  ;;  %s1640_s11 = scalar_lea.hbm %s1639_s10, 8 }
 0x40a   : > { %v1172_v59 = vsel %vm343_vm1, %v1171_v56, %v1154_v48  ;;  %v1167_v60 = vrot.slane %v1162_v57, 4  ;;  %v1170_v61 = vsel %vm343_vm1, %v1162_v57, %v1169_v58  ;;  %p1641_p1 = scmp.ne.s32.totalorder %s1639_s10, %s1640_s11  ;;  %p1646_p10 = scmp.lt.s32.totalorder %s1644_s15, %s1640_s11 }
 0x40b   : > { %1180 = vrot.lane.b32.xlu2 %v1172_v59, %s1724_s12  ;;  %1176 = vrot.lane.b32.xlu1 %v1170_v61, %s1725_s13 }
 0x40c   : > { %v1168_v62 = vsel %vm343_vm1, %v1167_v60, %v1150_v54  ;;  %p1642_p3 = pnand %p1641_p1, %p1830_p0  ;;  %p1647_p12 = por %p1646_p10, %p1645_p9 }
 0x40e   : > { %p1643_p8 = pneg %p1642_p3 }
 0x410   : > { %p1648_p13 = pnand %p1647_p12, %p1643_p8 }
 0x465   : > { %v1181_v1 = vpop.permute.xlu2 %1180 }
 0x47b   : > { %v1185_v3 = vpop.permute.xlu0 %1184 }
 0x47d   : > { %v1177_v23 = vpop.permute.xlu1 %1176 }
 0x47e   : > { %v1187_v2 = vsel %vm858_vm4, %v1168_v62, %v1177_v23 }
 0x47f   : > { %v1189_v4 = vsel %vm1188_vm5, %v1187_v2, %v1181_v1 }
 0x480   : > { %v1191_v5 = vsel %vm1190_vm6, %v1189_v4, %v1185_v3 }
 0x481   : > { %v1192_v6 = vpack.c.bf16 %v1191_v5, %v1191_v5 }
 0x483   : > { %1384 = vmatmul.msk.bf16.vlgmr.msra.gmra.mxu2 %vm315_vm0, %v1192_v6 }
 0x506   : > { %v1226_v8 = vpop.f32.mrf.mxu2 }
 0x507   : > { %v1227_v9 = vadd.f32 %v1517_v7, %v1226_v8 }
 0x509   : > { %1230 = vst.msk [vmem:[%s288_s7] sm:$0xff] %vm315_vm0, %v1227_v9 }
 0x50a   : > { %1651 = shalt.err (!%p1648_p13)
}
 0x50b   : > { %1403 = dma.vmem_to_hbm [thread:$0]  (%p1830_p0), %s1246_s25, 128, %s1248_s9, %s1232_s21  }
 0x50e   : > { %v1228_v10 = vpop.f32.mrf.mxu2 }
 0x50f PF: > { %s1259_s16 = sand.u32 1, %s1690_s18   ;;  %p1417_p2 = pnand %p1351_p6, %p1837_p5 }
 0x510   : > { %s1260_s24 = scalar_lea.sflag [#allocation7], %s1259_s16 }
 0x511   : > { %p1418_p4 = pneg %p1417_p2 }
 0x513   : > { %1685 = dma.done.wait (%p1418_p4), %s1260_s24, 128  }
 0x514   : > { %1687 = vsyncadd (%p1418_p4), %s1260_s24, 4294967168  ;;  %s22_s23 = sadd.s32 1, %s1710_s23   ;;  %s2130_s18 = smov %s1694_s19 }
 0x515   : > { %p19_p7 = scmp.ge.s32.totalorder %s22_s23, 4   ;;  %s2131_s19 = smov %s1698_s20 }
 0x516   : > { %s2132_s20 = smov %s1835_s28  ;;  %s2133_s21 = smov %s1706_s22 }
 0x517   : > { %s2134_s22 = smov %s2136_s14  ;;  %21 = sbr.rel (!%p19_p7) target bundleno = 7 (0x7), region = 97 }
 0x51c   :  { %1266 = vsyncpa [#allocation6], 1 }
 0x51d   :  { %1268 = vsyncpa [#allocation6 + $0x1], 1 }
 0x51e   :  { %1269 = vsyncpa [#allocation9], 1 }
 0x51f   :  { %1270 = vsyncpa [#allocation7], 1 }
 0x520   :  { %1272 = vsyncpa [#allocation7 + $0x1], 1 }

</bundles_post_ra>
